<compile_context>
chip_gen: v5e
topology: v5e:2x2
jax: 0.10.0
libtpu: 0.0.40
codegen_flags: <defaults>
</compile_context>

<pallas_src>
import functools

import jax
import jax.numpy as jnp
from jax.experimental import pallas as pl
from jax.experimental.pallas import tpu as pltpu


def _round_up(x, m):
    return (x + m - 1) // m * m


def patch_embed_kernel(x_ref, w_ref, ppb_ref, row0_ref, o_ref, *, k, np_):
    # x_ref:    (k*Np, D)    flattened patch rows for k batch elements
    # w_ref:    (D, Ep)      pre-transposed linear weight (grid-invariant)
    # ppb_ref:  (Np, Ep)     positions[1:] + bias        (grid-invariant)
    # row0_ref: (1, Ep)      cls_token + positions[0]    (grid-invariant)
    # o_ref:    (k, Np+1, Ep)
    proj = jnp.dot(x_ref[...], w_ref[...],
                   preferred_element_type=jnp.float32)          # (k*Np, Ep) on MXU
    ppb = ppb_ref[...]                                           # load once
    row0 = row0_ref[...]                                         # load once
    for i in range(k):                                           # k is small & static
        o_ref[i, 0:1, :] = row0.astype(o_ref.dtype)              # cls row
        o_ref[i, 1:, :] = (proj[i * np_:(i + 1) * np_, :]
                           + ppb).astype(o_ref.dtype)            # patch rows


def patch_embedding(x, weight, bias, cls_token, positions, patch_size):
    """x: (B, C, H, W) float32. Returns (B, (H//ps)*(W//ps) + 1, E)."""
    B, C, H, W = x.shape
    ps = patch_size
    h, w = H // ps, W // ps
    Np = h * w
    E, D = weight.shape
    assert D == ps * ps * C
    assert positions.shape == (Np + 1, E)

    # --- patchify 'b c (h s1) (w s2) -> b (h w) (s1 s2 c)' (wrapper glue) ---
    patches = x.reshape(B, C, h, ps, w, ps)
    patches = jnp.transpose(patches, (0, 2, 4, 3, 5, 1)).reshape(B * Np, D)

    # --- pad E up to a lane-dense multiple of 128 (no-op when E % 128 == 0) ---
    Ep = _round_up(E, 128)
    wT = weight.T                                   # (D, E): transpose once, outside
    pos = positions
    cls_flat = cls_token.reshape(1, E)
    if Ep != E:
        pad = Ep - E
        wT = jnp.pad(wT, ((0, 0), (0, pad)))
        bias = jnp.pad(bias, ((0, pad),))
        pos = jnp.pad(pos, ((0, 0), (0, pad)))
        cls_flat = jnp.pad(cls_flat, ((0, 0), (0, pad)))

    # Grid-invariant fusions done once in the wrapper.
    pos_plus_bias = pos[1:] + bias[None, :]         # (Np, Ep)
    row0 = cls_flat + pos[0:1]                      # (1, Ep)

    # --- choose how many batch elements to fuse per grid step so the MXU sees
    #     a reasonably tall M tile (target ~256 rows; 128 is fine on v5e). ---
    target_rows = 256
    k = 1
    for cand in range(min(B, max(1, target_rows // Np)), 0, -1):
        if B % cand == 0 and ((cand * Np) % 8 == 0 or cand == B):
            k = cand
            break
    G = B // k

    kernel = functools.partial(patch_embed_kernel, k=k, np_=Np)
    out = pl.pallas_call(
        kernel,
        out_shape=jax.ShapeDtypeStruct((B, Np + 1, Ep), jnp.float32),
        grid_spec=pltpu.PrefetchScalarGridSpec(
            num_scalar_prefetch=0,
            grid=(G,),
            in_specs=[
                pl.BlockSpec((k * Np, D), lambda g: (g, 0)),     # patch rows per group
                pl.BlockSpec((D, Ep), lambda g: (0, 0)),          # resident weight
                pl.BlockSpec((Np, Ep), lambda g: (0, 0)),         # resident pos+bias
                pl.BlockSpec((1, Ep), lambda g: (0, 0)),          # resident cls+pos0
            ],
            out_specs=pl.BlockSpec((k, Np + 1, Ep), lambda g: (g, 0, 0)),
        ),
        compiler_params=pltpu.CompilerParams(
            dimension_semantics=("parallel",)),
    )(patches, wT, pos_plus_bias, row0)

    if Ep != E:
        out = out[..., :E]
    return out


if __name__ == "__main__":
    # Small shapes consistent with the module:
    #   in_channels=4, patch_size=4, img_size=16, emb_size=32, batch=2
    B, C, img, ps, E = 2, 4, 16, 4, 32
    Np = (img // ps) ** 2          # 16
    D = ps * ps * C                # 64

    key = jax.random.PRNGKey(0)
    kx, kw, kb, kc, kp = jax.random.split(key, 5)
    x = jax.random.normal(kx, (B, C, img, img), dtype=jnp.float32)
    weight = jax.random.normal(kw, (E, D), dtype=jnp.float32) * 0.02
    bias = jax.random.normal(kb, (E,), dtype=jnp.float32) * 0.02
    cls_token = jax.random.normal(kc, (1, 1, E), dtype=jnp.float32)
    positions = jax.random.normal(kp, (Np + 1, E), dtype=jnp.float32)

    out = patch_embedding(x, weight, bias, cls_token, positions, ps)
    out = jax.block_until_ready(out)

    # Pure-JAX reference for sanity checking.
    patches = x.reshape(B, C, img // ps, ps, img // ps, ps)
    patches = jnp.transpose(patches, (0, 2, 4, 3, 5, 1)).reshape(B, Np, D)
    proj = patches @ weight.T + bias
    cls = jnp.broadcast_to(cls_token, (B, 1, E))
    ref = jnp.concatenate([cls, proj], axis=1) + positions

    assert out.shape == (B, Np + 1, E)
    assert jnp.allclose(out, ref, atol=1e-4, rtol=1e-4)
    print("KERNEL_OK")
</pallas_src>

<mosaic_0001>
module attributes {stable_mosaic.version = 11 : i64} {
  func.func @patch_embed_kernel(%arg0: i32, %arg1: memref<32x64xf32, #tpu.memory_space<vmem>>, %arg2: memref<64x128xf32, #tpu.memory_space<vmem>>, %arg3: memref<16x128xf32, #tpu.memory_space<vmem>>, %arg4: memref<1x128xf32, #tpu.memory_space<vmem>>, %arg5: memref<2x17x128xf32, #tpu.memory_space<vmem>>) attributes {dimension_semantics = [#tpu.dimension_semantics<parallel>], iteration_bounds = array<i64: 1>, scalar_prefetch = 0 : i64, scratch_operands = 0 : i64, tpu.core_type = #tpu.core_type<tc>, window_params = [{transform_indices = @transform_0, window_bounds = array<i64: 32, 64>}, {pipeline_mode = #tpu.pipeline_mode<synchronous>, transform_indices = @transform_1, window_bounds = array<i64: 64, 128>}, {pipeline_mode = #tpu.pipeline_mode<synchronous>, transform_indices = @transform_2, window_bounds = array<i64: 16, 128>}, {pipeline_mode = #tpu.pipeline_mode<synchronous>, transform_indices = @transform_3, window_bounds = array<i64: 1, 128>}, {transform_indices = @transform_4, window_bounds = array<i64: 2, 17, 128>}]} {
    %c0 = arith.constant 0 : index
    %c0_0 = arith.constant 0 : index
    %0 = vector.load %arg1[%c0, %c0_0] : memref<32x64xf32, #tpu.memory_space<vmem>>, vector<32x64xf32>
    %c0_1 = arith.constant 0 : index
    %c0_2 = arith.constant 0 : index
    %1 = vector.load %arg2[%c0_1, %c0_2] : memref<64x128xf32, #tpu.memory_space<vmem>>, vector<64x128xf32>
    %cst = arith.constant dense<0.000000e+00> : vector<32x128xf32>
    %2 = tpu.matmul %0, %1, %cst {dimension_numbers = #tpu.dot_dimension_numbers<[1], [0], [0], [1], [0, 0, 1, 1], [], []>} : vector<32x64xf32>, vector<64x128xf32>, vector<32x128xf32> -> vector<32x128xf32>
    %c0_3 = arith.constant 0 : index
    %c0_4 = arith.constant 0 : index
    %3 = vector.load %arg3[%c0_3, %c0_4] : memref<16x128xf32, #tpu.memory_space<vmem>>, vector<16x128xf32>
    %c0_5 = arith.constant 0 : index
    %c0_6 = arith.constant 0 : index
    %4 = vector.load %arg4[%c0_5, %c0_6] : memref<1x128xf32, #tpu.memory_space<vmem>>, vector<1x128xf32>
    %c0_7 = arith.constant 0 : index
    %c0_8 = arith.constant 0 : index
    %c0_9 = arith.constant 0 : index
    %5 = vector.load %arg5[%c0_7, %c0_8, %c0_9] : memref<2x17x128xf32, #tpu.memory_space<vmem>>, vector<1x1x128xf32>
    %6 = vector.shape_cast %5 : vector<1x1x128xf32> to vector<1x128xf32>
    %7 = vector.shape_cast %4 : vector<1x128xf32> to vector<1x1x128xf32>
    tpu.vector_store %arg5[%c0_7, %c0_8, %c0_9], %7 {strides = array<i32>} : memref<2x17x128xf32, #tpu.memory_space<vmem>>, vector<1x1x128xf32>,
    %8 = vector.extract_strided_slice %2 {offsets = [0, 0], sizes = [16, 128], strides = [1, 1]} : vector<32x128xf32> to vector<16x128xf32>
    %9 = arith.addf %8, %3 : vector<16x128xf32>
    %c0_10 = arith.constant 0 : index
    %c1 = arith.constant 1 : index
    %c0_11 = arith.constant 0 : index
    %10 = vector.load %arg5[%c0_10, %c1, %c0_11] : memref<2x17x128xf32, #tpu.memory_space<vmem>>, vector<1x16x128xf32>
    %11 = vector.shape_cast %10 : vector<1x16x128xf32> to vector<16x128xf32>
    %12 = vector.shape_cast %9 : vector<16x128xf32> to vector<1x16x128xf32>
    tpu.vector_store %arg5[%c0_10, %c1, %c0_11], %12 {strides = array<i32>} : memref<2x17x128xf32, #tpu.memory_space<vmem>>, vector<1x16x128xf32>,
    %c1_12 = arith.constant 1 : index
    %c0_13 = arith.constant 0 : index
    %c0_14 = arith.constant 0 : index
    %13 = vector.load %arg5[%c1_12, %c0_13, %c0_14] : memref<2x17x128xf32, #tpu.memory_space<vmem>>, vector<1x1x128xf32>
    %14 = vector.shape_cast %13 : vector<1x1x128xf32> to vector<1x128xf32>
    %15 = vector.shape_cast %4 : vector<1x128xf32> to vector<1x1x128xf32>
    tpu.vector_store %arg5[%c1_12, %c0_13, %c0_14], %15 {strides = array<i32>} : memref<2x17x128xf32, #tpu.memory_space<vmem>>, vector<1x1x128xf32>,
    %16 = vector.extract_strided_slice %2 {offsets = [16, 0], sizes = [16, 128], strides = [1, 1]} : vector<32x128xf32> to vector<16x128xf32>
    %17 = arith.addf %16, %3 : vector<16x128xf32>
    %c1_15 = arith.constant 1 : index
    %c1_16 = arith.constant 1 : index
    %c0_17 = arith.constant 0 : index
    %18 = vector.load %arg5[%c1_15, %c1_16, %c0_17] : memref<2x17x128xf32, #tpu.memory_space<vmem>>, vector<1x16x128xf32>
    %19 = vector.shape_cast %18 : vector<1x16x128xf32> to vector<16x128xf32>
    %20 = vector.shape_cast %17 : vector<16x128xf32> to vector<1x16x128xf32>
    tpu.vector_store %arg5[%c1_15, %c1_16, %c0_17], %20 {strides = array<i32>} : memref<2x17x128xf32, #tpu.memory_space<vmem>>, vector<1x16x128xf32>,
    return
  }
  func.func @transform_0(%arg0: i32) -> (i32, i32) {
    %c0_i32 = arith.constant 0 : i32
    %c0_i32_0 = arith.constant 0 : i32
    return %arg0, %c0_i32 : i32, i32
  }
  func.func @transform_1(%arg0: i32) -> (i32, i32) {
    %c0_i32 = arith.constant 0 : i32
    %c0_i32_0 = arith.constant 0 : i32
    %c0_i32_1 = arith.constant 0 : i32
    return %c0_i32, %c0_i32_0 : i32, i32
  }
  func.func @transform_2(%arg0: i32) -> (i32, i32) {
    %c0_i32 = arith.constant 0 : i32
    %c0_i32_0 = arith.constant 0 : i32
    %c0_i32_1 = arith.constant 0 : i32
    return %c0_i32, %c0_i32_0 : i32, i32
  }
  func.func @transform_3(%arg0: i32) -> (i32, i32) {
    %c0_i32 = arith.constant 0 : i32
    %c0_i32_0 = arith.constant 0 : i32
    %c0_i32_1 = arith.constant 0 : i32
    return %c0_i32, %c0_i32_0 : i32, i32
  }
  func.func @transform_4(%arg0: i32) -> (i32, i32, i32) {
    %c0_i32 = arith.constant 0 : i32
    %c0_i32_0 = arith.constant 0 : i32
    %c0_i32_1 = arith.constant 0 : i32
    return %arg0, %c0_i32, %c0_i32_0 : i32, i32, i32
  }
}

</mosaic_0001>

<bundles_post_ra>
// kernel: tpu_custom_call.1
= control target key start
LH: loop header
LB: loop body
LE: loop exit
PB: predicated region body
PF: predicated region fallthrough
CT: control target
= control target key end

     0   :  { %9 = vsyncpa [#allocation3], 0  ;;  %s310_s0 = inlined_call_operand.hbm [shape: f32[32,64], index: 0, kind: input, shape index: {}]   ;;  %s311_s1 = inlined_call_operand.hbm [shape: f32[64,128], index: 1, kind: input, shape index: {}]   ;;  %s312_s2 = inlined_call_operand.hbm [shape: f32[16,128], index: 2, kind: input, shape index: {}]   ;;  %s313_s3 = inlined_call_operand.vmem [shape: f32[1,128], index: 3, kind: input, shape index: {}]   ;;  %s314_s4 = inlined_call_operand.vmem [shape: f32[2,17,128], index: 4, kind: output, shape index: {}]  }
   0x1   :  { %10 = vsyncpa [#allocation5], 0  ;;  %s28_s17 = sshll.u32 %s311_s1, 4  ;;  %s250_s18 = smov [#allocation4]   ;;  %s29_s17 = int_to_ptr.hbm [resolvable:$true] %s28_s17 }
   0x2   :  { %s30_s19 = sshll.u32 %s250_s18, 4  ;;  %s15_s22 = sshll.u32 %s310_s0, 4  ;;  %s31_s19 = int_to_ptr.vmem [resolvable:$true] %s30_s19  ;;  %s16_s22 = int_to_ptr.hbm [resolvable:$true] %s15_s22 }
   0x3   :  { %s251_s23 = smov 128   ;;  %s252_s24 = smov 8  }
   0x4   :  { %36 = dma.hbm_to_vmem [thread:$0]  %s29_s17, 1024, %s31_s19, [#allocation5], %s251_s23, %s251_s23, %s252_s24  }
   0x5   :  { %s253_s25 = smov [#allocation2]   ;;  %s41_s29 = sshll.u32 %s312_s2, 4  ;;  %s42_s29 = int_to_ptr.hbm [resolvable:$true] %s41_s29 }
   0x6   :  { %s17_s26 = sshll.u32 %s253_s25, 4  ;;  %s254_s1 = smov [#allocation6]   ;;  %s18_s26 = int_to_ptr.vmem [resolvable:$true] %s17_s26 }
   0x7   :  { %23 = dma.hbm_to_vmem [thread:$0]  %s16_s22, 512, %s18_s26, [#allocation3], %s251_s23, %s251_s23, %s252_s24  }
   0x8   :  { %s43_s30 = sshll.u32 %s254_s1, 4  ;;  %s44_s30 = int_to_ptr.vmem [resolvable:$true] %s43_s30 }
   0x9   :  { %49 = dma.hbm_to_vmem [thread:$0]  %s42_s29, 256, %s44_s30, [#allocation5], %s251_s23, %s251_s23, %s252_s24  }
   0xa   :  { %246 = dma.done.wait [#allocation3], 512  }
   0xb   :  { %247 = vsyncadd [#allocation3], 4294966784 }
   0xc   :  { %248 = dma.done.wait [#allocation5], 1280  }
   0xd   :  { %249 = vsyncadd [#allocation5], 4294966016  ;;  %v120_v0 = vld [vmem:[%s313_s3] sm:$0x1]  ;;  %v75_v1 = vld [vmem:[#allocation4 + $0x38] sm:$0xff]  ;;  %vm76_vm0 = vcmask 523264  }
   0xe   :  { %v74_v2 = vld [vmem:[#allocation4 + $0x30] sm:$0xff]  ;;  %121 = vst [vmem:[%s314_s4] sm:$0x1] %v120_v0  ;;  %146 = vmatpush.msra.mxu2 %v75_v1  ;;  %147 = vmatpush.msra.mxu3 %v75_v1  ;;  %v73_v3 = vld [vmem:[#allocation4 + $0x28] sm:$0xff]  ;;  %v72_v4 = vld [vmem:[#allocation4 + $0x20] sm:$0xff] }
   0xf   :  { %142 = vst [vmem:[%s314_s4 + $0x18] sm:$0x1] %v120_v0  ;;  %97 = vmatpush.msra.mxu0 %v75_v1  ;;  %145 = vmatpush.msra.mxu1 %v75_v1  ;;  %v71_v5 = vld [vmem:[#allocation4 + $0x18] sm:$0xff]  ;;  %v70_v6 = vld [vmem:[#allocation4 + $0x10] sm:$0xff]  ;;  %v69_v7 = vld [vmem:[#allocation4 + $0x8] sm:$0xff] }
  0x10   :  { %149 = vmatpush.msra.mxu2 %v74_v2  ;;  %150 = vmatpush.msra.mxu3 %v74_v2  ;;  %v68_v8 = vld [vmem:[#allocation4] sm:$0xff]  ;;  %v66_v9 = vld [vmem:[#allocation2 + $0x10] sm:$0xff]  ;;  %v67_v10 = vld [vmem:[#allocation2 + $0x18] sm:$0xff] }
  0x11   :  { %98 = vmatpush.msra.mxu0 %v74_v2  ;;  %148 = vmatpush.msra.mxu1 %v74_v2  ;;  %v64_v11 = vld [vmem:[#allocation2] sm:$0xff]  ;;  %v65_v12 = vld [vmem:[#allocation2 + $0x8] sm:$0xff] }
  0x12   :  { %152 = vmatpush.msra.mxu2 %v73_v3  ;;  %153 = vmatpush.msra.mxu3 %v73_v3  ;;  %v118_v13 = vld [vmem:[#allocation6] sm:$0xff]  ;;  %v119_v14 = vld [vmem:[#allocation6 + $0x8] sm:$0xff] }
  0x13   :  { %99 = vmatpush.msra.mxu0 %v73_v3  ;;  %151 = vmatpush.msra.mxu1 %v73_v3 }
  0x14   :  { %155 = vmatpush.msra.mxu2 %v72_v4  ;;  %156 = vmatpush.msra.mxu3 %v72_v4 }
  0x15   :  { %100 = vmatpush.msra.mxu0 %v72_v4  ;;  %154 = vmatpush.msra.mxu1 %v72_v4 }
  0x16   :  { %158 = vmatpush.msra.mxu2 %v71_v5  ;;  %159 = vmatpush.msra.mxu3 %v71_v5 }
  0x17   :  { %101 = vmatpush.msra.mxu0 %v71_v5  ;;  %157 = vmatpush.msra.mxu1 %v71_v5 }
  0x18   :  { %161 = vmatpush.msra.mxu2 %v70_v6  ;;  %162 = vmatpush.msra.mxu3 %v70_v6 }
  0x19   :  { %102 = vmatpush.msra.mxu0 %v70_v6  ;;  %160 = vmatpush.msra.mxu1 %v70_v6 }
  0x1a   :  { %164 = vmatpush.msra.mxu2 %v69_v7  ;;  %165 = vmatpush.msra.mxu3 %v69_v7 }
  0x1b   :  { %103 = vmatpush.msra.mxu0 %v69_v7  ;;  %163 = vmatpush.msra.mxu1 %v69_v7 }
  0x1c   :  { %167 = vmatpush.msra.mxu2 %v68_v8  ;;  %168 = vmatpush.msra.mxu3 %v68_v8 }
  0x1d   :  { %140 = vmatmul.msk.f32.vlgmr.msra.gmra.mxu2 %vm76_vm0, %v66_v9  ;;  %141 = vmatmul.msk.f32.vlgmr.msra.gmra.mxu3 %vm76_vm0, %v67_v10 }
  0x1e   :  { %104 = vmatpush.msra.mxu0 %v68_v8  ;;  %166 = vmatpush.msra.mxu1 %v68_v8 }
  0x1f   :  { %138 = vmatmul.msk.f32.vlgmr.msra.gmra.mxu0 %vm76_vm0, %v64_v11  ;;  %139 = vmatmul.msk.f32.vlgmr.msra.gmra.mxu1 %vm76_vm0, %v65_v12 }
  0x9c   :  { %v106_v15 = vpop.f32.mrf.mxu0  ;;  %v109_v16 = vpop.f32.mrf.mxu1 }
  0x9d   :  { %v122_v17 = vadd.f32 %v118_v13, %v106_v15  ;;  %v123_v18 = vadd.f32 %v119_v14, %v109_v16 }
  0x9f   :  { %124 = vst [vmem:[%s314_s4 + $0x1] sm:$0xff] %v122_v17 }
  0xa0   :  { %125 = vst [vmem:[%s314_s4 + $0x9] sm:$0xff] %v123_v18  ;;  %v112_v19 = vpop.f32.mrf.mxu2  ;;  %v115_v20 = vpop.f32.mrf.mxu3 }
  0xa1   :  { %v128_v21 = vadd.f32 %v118_v13, %v112_v19  ;;  %v129_v22 = vadd.f32 %v119_v14, %v115_v20 }
  0xa3   :  { %143 = vst [vmem:[%s314_s4 + $0x19] sm:$0xff] %v128_v21 }
  0xa4   :  { %144 = vst [vmem:[%s314_s4 + $0x21] sm:$0xff] %v129_v22 }
  0xa5   :  { %136 = vsyncpa [#allocation3], 1 }
  0xa6   :  { %137 = vsyncpa [#allocation5], 1 }

</bundles_post_ra>
